<compile_context>
chip_gen: v7x
topology: tpu7x:2x2x1
jax: 0.10.0
libtpu: 0.0.40
codegen_flags: <defaults>
</compile_context>

<pallas_src>
import math

import jax
import jax.numpy as jnp
from jax.experimental import pallas as pl
from jax.experimental.pallas import tpu as pltpu


def prenorm_kernel(x_ref, g_ref, o_ref):
    # x_ref: (1, C, TN) block, g_ref: (1, C, 1)
    x = x_ref[...].astype(jnp.float32)                       # f32 accumulation
    c = x_ref.shape[1]

    # F.normalize(x, dim=1) with eps=1e-12:
    #   1 / max(||x||, 1e-12) == rsqrt(max(sum(x^2), 1e-24))
    ssq = jnp.sum(x * x, axis=1, keepdims=True)              # (1, 1, TN)
    # rsqrt runs on the EUP (separate VLIW slot -> ~free under mem-bound);
    # fold sqrt(C) into the small per-lane scale instead of the full tile.
    scale = jax.lax.rsqrt(jnp.maximum(ssq, 1e-24)) * jnp.float32(math.sqrt(c))

    g = g_ref[...].astype(jnp.float32)                       # (1, C, 1)
    normed = x * scale * g                                    # one mul per bcast axis

    # fn == identity (see TODO above)
    o_ref[...] = normed.astype(o_ref.dtype)


def _pick_tile_n(C, N, itemsize):
    """Lane-dense tile: multiple of 128, sized so the 4 pipelined x/o buffers
    (2 in + 2 out, double-buffered) stay well under the v7x VMEM budget."""
    if N <= 128:
        return N                                              # full-dim block is legal
    budget_bytes = 16 * 1024 * 1024                           # for 4 * C * TN * itemsize
    max_tn = budget_bytes // (4 * C * itemsize)
    tn = min(N, 2048, max(128, (max_tn // 128) * 128))
    tn = (tn // 128) * 128
    tn = max(tn, 128)
    # Prefer a multiple of 128 that divides N (avoids ragged last tiles).
    for cand in range(tn, 127, -128):
        if N % cand == 0:
            return cand
    return tn                                                 # ragged tail handled by Pallas


def prenorm(x, g):
    B, C, N = x.shape
    itemsize = jnp.dtype(x.dtype).itemsize
    tn = _pick_tile_n(C, N, itemsize)
    grid = (B, pl.cdiv(N, tn))

    # Explicit VMEM limit with headroom (v7x-safe: 64 MiB physical per TC).
    buf_bytes = 4 * C * tn * itemsize + 2 * C * itemsize
    vmem_limit = int(min(64 * 1024 * 1024,
                         max(32 * 1024 * 1024, 2 * buf_bytes)))

    cost = pl.CostEstimate(
        flops=4 * B * C * N,
        transcendentals=B * N,
        bytes_accessed=2 * B * C * N * itemsize + C * itemsize,
    )

    return pl.pallas_call(
        prenorm_kernel,
        out_shape=jax.ShapeDtypeStruct((B, C, N), x.dtype),
        grid=grid,
        in_specs=[
            pl.BlockSpec((1, C, tn), lambda b, n: (b, 0, n)),  # per-(batch, N-tile) slab
            pl.BlockSpec((1, C, 1), lambda b, n: (0, 0, 0)),   # g replicated
        ],
        out_specs=pl.BlockSpec((1, C, tn), lambda b, n: (b, 0, n)),
        compiler_params=pltpu.CompilerParams(
            dimension_semantics=("parallel", "parallel"),
            vmem_limit_bytes=vmem_limit,
        ),
        cost_estimate=cost,
    )(x, g)


def prenorm_ref(x, g):
    x32 = x.astype(jnp.float32)
    ssq = jnp.sum(x32 * x32, axis=1, keepdims=True)
    denom = jnp.maximum(jnp.sqrt(ssq), 1e-12)
    out = (x32 / denom) * g.astype(jnp.float32) * jnp.float32(math.sqrt(x.shape[1]))
    return out.astype(x.dtype)


if __name__ == "__main__":
    B, C, N = 2, 32, 256   # (batch, dim, positions) -> grid (2, 2) with TN=128

    key = jax.random.PRNGKey(0)
    x = jax.random.normal(key, (B, C, N), dtype=jnp.float32)
    # nn.Parameter(torch.ones(1, dim, 1)) -> deterministic ones init
    g = jnp.ones((1, C, 1), dtype=jnp.float32)

    out = prenorm(x, g)
    out = jax.block_until_ready(out)

    ref = prenorm_ref(x, g)
    assert out.shape == (B, C, N)
    assert jnp.allclose(out, ref, atol=1e-5, rtol=1e-5)

    print("KERNEL_OK")
</pallas_src>

<mosaic_0001>
module attributes {stable_mosaic.version = 11 : i64} {
  func.func @prenorm_kernel(%arg0: i32, %arg1: i32, %arg2: memref<1x32x256xf32, #tpu.memory_space<vmem>>, %arg3: memref<1x32x1xf32, #tpu.memory_space<vmem>>, %arg4: memref<1x32x256xf32, #tpu.memory_space<vmem>>) attributes {dimension_semantics = [#tpu.dimension_semantics<parallel>, #tpu.dimension_semantics<parallel>], iteration_bounds = array<i64: 2, 1>, scalar_prefetch = 0 : i64, scratch_operands = 0 : i64, tpu.core_type = #tpu.core_type<tc>, window_params = [{transform_indices = @transform_0, window_bounds = array<i64: 1, 32, 256>}, {pipeline_mode = #tpu.pipeline_mode<synchronous>, transform_indices = @transform_1, window_bounds = array<i64: 1, 32, 1>}, {transform_indices = @transform_2, window_bounds = array<i64: 1, 32, 256>}]} {
    %c0 = arith.constant 0 : index
    %c0_0 = arith.constant 0 : index
    %c0_1 = arith.constant 0 : index
    %0 = vector.load %arg2[%c0, %c0_0, %c0_1] : memref<1x32x256xf32, #tpu.memory_space<vmem>>, vector<1x32x256xf32>
    %1 = arith.mulf %0, %0 : vector<1x32x256xf32>
    %cst = arith.constant dense<0.000000e+00> : vector<1x256xf32>
    %2 = vector.multi_reduction <add>, %1, %cst [1] : vector<1x32x256xf32> to vector<1x256xf32>
    %3 = vector.shape_cast %2 : vector<1x256xf32> to vector<1x1x256xf32>
    %cst_2 = arith.constant 1.000000e-24 : f32
    %4 = vector.broadcast %cst_2 : f32 to vector<1x1x256xf32>
    %5 = arith.maximumf %3, %4 : vector<1x1x256xf32>
    %6 = math.rsqrt %5 : vector<1x1x256xf32>
    %cst_3 = arith.constant 5.65685415 : f32
    %7 = vector.broadcast %cst_3 : f32 to vector<1x1x256xf32>
    %8 = arith.mulf %6, %7 : vector<1x1x256xf32>
    %c0_4 = arith.constant 0 : index
    %c0_5 = arith.constant 0 : index
    %c0_6 = arith.constant 0 : index
    %9 = vector.load %arg3[%c0_4, %c0_5, %c0_6] : memref<1x32x1xf32, #tpu.memory_space<vmem>>, vector<1x32x1xf32>
    %10 = vector.broadcast %8 : vector<1x1x256xf32> to vector<1x32x256xf32>
    %11 = arith.mulf %0, %10 : vector<1x32x256xf32>
    %12 = vector.broadcast %9 : vector<1x32x1xf32> to vector<1x32x256xf32>
    %13 = arith.mulf %11, %12 : vector<1x32x256xf32>
    %c0_7 = arith.constant 0 : index
    %c0_8 = arith.constant 0 : index
    %c0_9 = arith.constant 0 : index
    %14 = vector.load %arg4[%c0_7, %c0_8, %c0_9] : memref<1x32x256xf32, #tpu.memory_space<vmem>>, vector<1x32x256xf32>
    tpu.vector_store %arg4[%c0_7, %c0_8, %c0_9], %13 {strides = array<i32>} : memref<1x32x256xf32, #tpu.memory_space<vmem>>, vector<1x32x256xf32>,
    return
  }
  func.func @transform_0(%arg0: i32, %arg1: i32) -> (i32, i32, i32) {
    %c0_i32 = arith.constant 0 : i32
    %c0_i32_0 = arith.constant 0 : i32
    return %arg0, %c0_i32, %arg1 : i32, i32, i32
  }
  func.func @transform_1(%arg0: i32, %arg1: i32) -> (i32, i32, i32) {
    %c0_i32 = arith.constant 0 : i32
    %c0_i32_0 = arith.constant 0 : i32
    %c0_i32_1 = arith.constant 0 : i32
    %c0_i32_2 = arith.constant 0 : i32
    return %c0_i32, %c0_i32_0, %c0_i32_1 : i32, i32, i32
  }
  func.func @transform_2(%arg0: i32, %arg1: i32) -> (i32, i32, i32) {
    %c0_i32 = arith.constant 0 : i32
    %c0_i32_0 = arith.constant 0 : i32
    return %arg0, %c0_i32, %arg1 : i32, i32, i32
  }
}

</mosaic_0001>

<bundles_post_ra>
// kernel: tpu_custom_call.1
= control target key start
LH: loop header
LB: loop body
LE: loop exit
PB: predicated region body
PF: predicated region fallthrough
CT: control target
= control target key end

     0   :  { %7 = vsyncpa [#allocation3], 0  ;;  %s790_s0 = inlined_call_operand.hbm [shape: f32[2,32,256], index: 0, kind: input, shape index: {}]   ;;  %s791_s1 = inlined_call_operand.vmem [shape: f32[1,32,1], index: 1, kind: input, shape index: {}]   ;;  %s792_s2 = inlined_call_operand.hbm [shape: f32[2,32,256], index: 2, kind: output, shape index: {}]  }
   0x1   :  { %9 = vsyncpa [#allocation3 + $0x1], 0 }
   0x2   :  { %10 = vsyncpa [#allocation4], 0 }
   0x3   :  { %12 = vsyncpa [#allocation4 + $0x1], 0  ;;  %s599_s9 = smov 0   ;;  %s601_s10 = smov 0  }
   0x4   :  { %s603_s11 = smov 0   ;;  %s605_s12 = smov 0  }
   0x5   :  { %s607_s13 = smov 0   ;;  %s609_s14 = smov 0  }
   0x6 LB: > { %s373_s15 = sadd.s32 4294967295, %s575_s14   ;;  %s374_s16 = sadd.s32 4294967294, %s575_s14   ;;  %s575_s14 = sphi %s609_s14, %s18_s14   ;;  %s571_s13 = sphi %s607_s13, %s807_s13   ;;  %s567_s12 = sphi %s605_s12, %s806_s12   ;;  %s563_s11 = sphi %s603_s11, %s805_s11   ;;  %s559_s10 = sphi %s601_s10, %s804_s10   ;;  %s555_s9 = sphi %s599_s9, %s803_s9  }
   0x7   : > { %s30_s17 = sadd.s32 1, %s571_s13  ;;  %s39_s18 = sadd.s32 1, %s563_s11 }
   0x8   : > { %p32_p0 = scmp.ge.s32.totalorder %s30_s17, 2  ;;  %p46_p1 = scmp.ne.s32.totalorder %s563_s11, %s559_s10 }
   0x9   : > { %p47_p2 = scmp.eq.s32.totalorder %s575_s14, 0  ;;  %p52_p3 = scmp.ne.s32.totalorder %s559_s10, %s555_s9 }
   0xa   : > { %s809_s17 = smov (%p32_p0, %s30_s17), 0  ;;  %p53_p5 = scmp.eq.s32.totalorder %s373_s15, 0 }
   0xb   : > { %p640_p4 = por %p47_p2, %p46_p1  ;;  %s34_s20 = ssub.s32 %s571_s13, %s809_s17 }
   0xc   : > { %p99_p6 = scmp.eq.s32.totalorder %s373_s15, 1  ;;  %p37_p7 = scmp.eq.s32.totalorder %s34_s20, 0 }
   0xd   : > { %p646_p8 = por %p53_p5, %p52_p3  ;;  %p105_p10 = scmp.eq.s32.totalorder %s374_s16, 1 }
   0xe   : > { %p650_p9 = por %p99_p6, %p46_p1  ;;  %p402_p13 = scmp.lt.s32.totalorder %s575_s14, 2 }
   0xf   : > { %s655_s23 = scalar_select %p37_p7, %s563_s11, %s39_s18  }
  0x10   : > { %s796_s22 = scalar_select %p650_p9, 1, 0 }
  0x11   : > { %p657_p11 = por %p105_p10, %p52_p3  ;;  %s128_s25 = sand.u32 1, %s563_s11  }
  0x12   : > { %s377_s26 = sshll.u32 %s128_s25, 6  ;;  %s388_s27 = sshll.u32 %s571_s13, 10 }
  0x13   : > { %s797_s24 = scalar_select %p657_p11, 1, 0 }
  0x14   : > { %s668_s30 = scalar_lea.hbm %s790_s0, %s388_s27  ;;  %s132_s3 = scalar_lea.vmem [#allocation2], %s377_s26 }
  0x15   : > { %s141_s4 = sshll.u32 %s132_s3, 4  ;;  %p674_p0 = pnand %p402_p13, %p640_p4  ;;  %s670_s4 = int_to_ptr.vmem [resolvable:$true] %s141_s4 }
  0x16   : > { %s679_s6 = scalar_lea.sflag [#allocation3], %s128_s25  ;;  %s463_s7 = scalar_lea.hbm %s668_s30, 1024 }
  0x17   : > { %p464_p2 = scmp.ne.s32.totalorder %s668_s30, %s463_s7  ;;  %p465_p3 = pneg %p674_p0 }
  0x18   : > { %s468_s16 = scalar_lea.hbm %s790_s0, 2048  ;;  %p469_p4 = scmp.lt.u32.totalorder %s668_s30, %s790_s0 }
  0x19   : > { %p466_p5 = pnand %p465_p3, %p464_p2  ;;  %p470_p7 = scmp.lt.u32.totalorder %s468_s16, %s463_s7 }
  0x1a   : > { %p472_p13 = scmp.lt.u32.totalorder %s463_s7, %s668_s30 }
  0x1b   : > { %p467_p6 = pneg %p466_p5  ;;  %p471_p10 = por %p470_p7, %p469_p4 }
  0x1d   : > { %p473_p12 = por %p472_p13, %p471_p10 }
  0x1f   : > { %p474_p1 = pnand %p473_p12, %p467_p6 }
  0x21   : > { %477 = shalt.err (!%p474_p1)
}
  0x22   : > { %s478_s20 = scalar_lea.vmem %s670_s4, 1024  ;;  %s577_s25 = smov [#allocation2]  }
  0x23   : > { %p479_p2 = scmp.ne.s32.totalorder %s670_s4, %s478_s20  ;;  %s483_s26 = sshll.u32 %s577_s25, 4  ;;  %s484_s26 = int_to_ptr.vmem [resolvable:$false] %s483_s26 }
  0x24   : > { %s485_s27 = scalar_lea.vmem %s484_s26, 2048  ;;  %p486_p9 = scmp.lt.s32.totalorder %s670_s4, %s484_s26 }
  0x25   : > { %p481_p5 = pnand %p479_p2, %p465_p3  ;;  %p487_p4 = scmp.lt.s32.totalorder %s485_s27, %s478_s20 }
  0x27   : > { %p482_p11 = pneg %p481_p5  ;;  %p488_p7 = por %p487_p4, %p486_p9 }
  0x29   : > { %p489_p10 = pnand %p488_p7, %p482_p11 }
  0x2b   : > { %492 = shalt.err (!%p489_p10)
}
  0x2c   : > { %s578_s28 = smov 256   ;;  %s579_s29 = smov 16  }
  0x2d   : > { %397 = dma.hbm_to_vmem [thread:$0]  (!%p674_p0), %s668_s30, 1024, %s670_s4, %s679_s6, %s578_s28, %s578_s28, %s579_s29  }
  0x2e   : > { %p149_p12 = scmp.lt.s32.totalorder %s575_s14, 3  ;;  %p799_p1 = scmp.ge.s32.totalorder %s575_s14, 1 }
  0x30   : > { %p150_p3 = pnand %p799_p1, %p149_p12 }
  0x31   : > { %s711_s3 = sand.u32 (!%p150_p3), 1, %s559_s10  }
  0x32   : > { %153 = sbr.rel (%p150_p3) target bundleno = 210 (0xd2), region = 28  ;;  %s381_s7 = sshll.u32 (!%p150_p3), %s711_s3, 6 }
  0x33   : > { %s156_s8 = scalar_lea.sflag (!%p150_p3), [#allocation3], %s711_s3  ;;  %s159_s15 = scalar_lea.vmem (!%p150_p3), [#allocation2], %s381_s7 }
  0x39   : > { %546 = dma.done.wait (%p646_p8), %s156_s8, 1024  }
  0x3a   : > { %548 = vsyncadd (%p646_p8), %s156_s8, 4294966272  ;;  %v580_v0 = vmov 0   ;;  %v224_v1 = vld [vmem:[%s791_s1 + $0x10] sm:$0xff]  ;;  %v222_v2 = vld [vmem:[%s791_s1] sm:$0xff]  ;;  %s179_s20 = scalar_lea.vmem [#allocation5], %s381_s7  ;;  %s389_s26 = sshll.u32 %s567_s12, 10 }
  0x3b   : > { %458 = vset.pattern.permute.xlu1 %v580_v0  ;;  %457 = vset.pattern.permute.xlu0 %v580_v0  ;;  %v225_v3 = vld [vmem:[%s791_s1 + $0x18] sm:$0xff]  ;;  %v223_v4 = vld [vmem:[%s791_s1 + $0x8] sm:$0xff]  ;;  %v182_v5 = vld [vmem:[%s159_s15] sm:$0xff]  ;;  %s286_s25 = sshll.u32 %s179_s20, 4  ;;  %s741_s29 = scalar_lea.hbm %s792_s2, %s389_s26  ;;  %s736_s25 = int_to_ptr.vmem [resolvable:$true] %s286_s25 }
  0x3c   : > { %246 = vperm.xlu1 %458, %v224_v1   ;;  %236 = vperm.xlu0 %457, %v222_v2   ;;  %v184_v6 = vld [vmem:[%s159_s15 + $0x10] sm:$0xff]  ;;  %v183_v7 = vld [vmem:[%s159_s15 + $0x8] sm:$0xff]  ;;  %v185_v8 = vld [vmem:[%s159_s15 + $0x18] sm:$0xff]  ;;  %v190_v9 = vmul.f32 %v182_v5, %v182_v5  ;;  %s271_s12 = scalar_lea.sflag [#allocation4], %s711_s3  ;;  %s493_s7 = scalar_lea.vmem %s736_s25, 1024 }
  0x3d   : > { %v192_v10 = vmul.f32 %v184_v6, %v184_v6  ;;  %v186_v11 = vld [vmem:[%s159_s15 + $0x20] sm:$0xff]  ;;  %v191_v12 = vmul.f32 %v183_v7, %v183_v7  ;;  %v193_v13 = vmul.f32 %v185_v8, %v185_v8  ;;  %v187_v14 = vld [vmem:[%s159_s15 + $0x28] sm:$0xff]  ;;  %v188_v17 = vld [vmem:[%s159_s15 + $0x30] sm:$0xff]  ;;  %p494_p8 = scmp.ne.s32.totalorder %s736_s25, %s493_s7  ;;  %p800_p9 = scmp.ne.s32.totalorder %s796_s22, 0 }
  0x3e   : > { %v194_v15 = vmul.f32 %v186_v11, %v186_v11  ;;  %v195_v18 = vmul.f32 %v187_v14, %v187_v14  ;;  %v189_v20 = vld [vmem:[%s159_s15 + $0x38] sm:$0xff]  ;;  %v196_v21 = vmul.f32 %v188_v17, %v188_v17  ;;  %s581_s8 = smov [#allocation5]  }
  0x3f   : > { %v198_v16 = vadd.f32 %v192_v10, %v190_v9  ;;  %v207_v19 = vadd.f32 %v193_v13, %v191_v12  ;;  %v197_v23 = vmul.f32 %v189_v20, %v189_v20  ;;  %p495_p11 = pnand %p494_p8, %p800_p9  ;;  %s497_s15 = sshll.u32 %s581_s8, 4  ;;  %s498_s15 = int_to_ptr.vmem [resolvable:$false] %s497_s15 }
  0x40   : > { %251 = vperm.xlu1 %458, %v225_v3   ;;  %241 = vperm.xlu0 %457, %v223_v4   ;;  %s499_s30 = scalar_lea.vmem %s498_s15, 2048  ;;  %p500_p6 = scmp.lt.s32.totalorder %s736_s25, %s498_s15 }
  0x41   : > { %v199_v22 = vadd.f32 %v198_v16, %v194_v15  ;;  %v208_v24 = vadd.f32 %v207_v19, %v195_v18  ;;  %p496_p0 = pneg %p495_p11  ;;  %p501_p13 = scmp.lt.s32.totalorder %s499_s30, %s493_s7 }
  0x43   : > { %v200_v25 = vadd.f32 %v199_v22, %v196_v21  ;;  %v209_v26 = vadd.f32 %v208_v24, %v197_v23  ;;  %p502_p2 = por %p501_p13, %p500_p6 }
  0x45   : > { %v201_v27 = vrot.slane %v200_v25, 4  ;;  %v210_v28 = vrot.slane %v209_v26, 4  ;;  %p503_p5 = pnand %p502_p2, %p496_p0 }
  0x47   : > { %v202_v29 = vadd.f32 %v201_v27, %v200_v25  ;;  %v211_v30 = vadd.f32 %v210_v28, %v209_v26 }
  0x49   : > { %v203_v31 = vrot.slane %v202_v29, 2  ;;  %v212_v32 = vrot.slane %v211_v30, 2 }
  0x4b   : > { %v204_v33 = vadd.f32 %v203_v31, %v202_v29  ;;  %v213_v34 = vadd.f32 %v212_v32, %v211_v30 }
  0x4d   : > { %v205_v35 = vrot.slane %v204_v33, 1  ;;  %v214_v36 = vrot.slane %v213_v34, 1 }
  0x4f   : > { %v206_v37 = vadd.f32 %v205_v35, %v204_v33  ;;  %v215_v38 = vadd.f32 %v214_v36, %v213_v34 }
  0x51   : > { %v216_v39 = vmax.f32 %v206_v37, 1e-24  ;;  %v217_v40 = vmax.f32 %v215_v38, 1e-24 }
  0x53   : > { %459 = vrsqrt.f32 %v216_v39 }
  0x54   : > { %461 = vrsqrt.f32 %v217_v40 }
  0x5d   : > { %v460_v41 = vpop.eup %459 }
  0x5e   : > { %v462_v42 = vpop.eup %461  ;;  %v220_v43 = vmul.f32 5.656854, %v460_v41 }
  0x5f   : > { %v221_v44 = vmul.f32 5.656854, %v462_v42 }
  0x60   : > { %v230_v45 = vmul.f32 %v220_v43, %v186_v11  ;;  %v226_v47 = vmul.f32 %v220_v43, %v182_v5  ;;  %v232_v51 = vmul.f32 %v220_v43, %v188_v17  ;;  %v228_v53 = vmul.f32 %v220_v43, %v184_v6 }
  0x61   : > { %v231_v46 = vmul.f32 %v221_v44, %v187_v14  ;;  %v227_v48 = vmul.f32 %v221_v44, %v183_v7  ;;  %v233_v52 = vmul.f32 %v221_v44, %v189_v20  ;;  %v229_v54 = vmul.f32 %v221_v44, %v185_v8 }
  0xbb   : > { %v247_v49 = vpop.permute.xlu1 %246  ;;  %v237_v50 = vpop.permute.xlu0 %236 }
  0xbc   : > { %v258_v55 = vmul.f32 %v247_v49, %v230_v45  ;;  %v259_v56 = vmul.f32 %v247_v49, %v231_v46  ;;  %v254_v57 = vmul.f32 %v237_v50, %v226_v47  ;;  %v255_v58 = vmul.f32 %v237_v50, %v227_v48 }
  0xbe   : > { %266 = vst [vmem:[%s179_s20 + $0x20] sm:$0xff] %v258_v55  ;;  %267 = vst [vmem:[%s179_s20 + $0x28] sm:$0xff] %v259_v56 }
  0xbf   : > { %262 = vst [vmem:[%s179_s20] sm:$0xff] %v254_v57  ;;  %263 = vst [vmem:[%s179_s20 + $0x8] sm:$0xff] %v255_v58  ;;  %v252_v59 = vpop.permute.xlu1 %251  ;;  %v242_v60 = vpop.permute.xlu0 %241 }
  0xc0   : > { %v260_v61 = vmul.f32 %v252_v59, %v232_v51  ;;  %v261_v62 = vmul.f32 %v252_v59, %v233_v52  ;;  %v256_v63 = vmul.f32 %v242_v60, %v228_v53  ;;  %v257_v0 = vmul.f32 %v242_v60, %v229_v54 }
  0xc2   : > { %268 = vst [vmem:[%s179_s20 + $0x30] sm:$0xff] %v260_v61  ;;  %269 = vst [vmem:[%s179_s20 + $0x38] sm:$0xff] %v261_v62 }
  0xc3   : > { %264 = vst [vmem:[%s179_s20 + $0x10] sm:$0xff] %v256_v63  ;;  %265 = vst [vmem:[%s179_s20 + $0x18] sm:$0xff] %v257_v0 }
  0xc4   : > { %506 = shalt.err (!%p503_p5)
}
  0xc5   : > { %s507_s4 = scalar_lea.hbm %s741_s29, 1024  ;;  %s511_s16 = scalar_lea.hbm %s792_s2, 2048 }
  0xc6   : > { %p508_p4 = scmp.ne.s32.totalorder %s741_s29, %s507_s4  ;;  %p512_p12 = scmp.lt.u32.totalorder %s741_s29, %s792_s2 }
  0xc7   : > { %p513_p1 = scmp.lt.u32.totalorder %s511_s16, %s507_s4  ;;  %p515_p8 = scmp.lt.u32.totalorder %s507_s4, %s741_s29 }
  0xc8   : > { %p509_p7 = pnand %p508_p4, %p800_p9 }
  0xc9   : > { %p514_p3 = por %p513_p1, %p512_p12 }
  0xca   : > { %p510_p10 = pneg %p509_p7 }
  0xcb   : > { %p516_p11 = por %p515_p8, %p514_p3 }
  0xcd   : > { %p517_p0 = pnand %p516_p11, %p510_p10 }
  0xcf   : > { %520 = shalt.err (!%p517_p0)
}
  0xd0   : > { %s582_s21 = smov 256   ;;  %s583_s20 = smov 16  }
  0xd1   : > { %392 = dma.vmem_to_hbm [thread:$0]  (%p800_p9), %s736_s25, 1024, %s741_s29, %s271_s12, %s582_s21, %s582_s21, %s583_s20  }
  0xd2 PF: > { %s301_s26 = sand.u32 1, %s555_s9   ;;  %p801_p6 = scmp.ne.s32.totalorder %s797_s24, 0 }
  0xd3   : > { %p802_p13 = scmp.ge.s32.totalorder %s575_s14, 2  ;;  %s302_s27 = scalar_lea.sflag [#allocation4], %s301_s26 }
  0xd5   : > { %p399_p2 = pnand %p802_p13, %p801_p6 }
  0xd7   : > { %550 = dma.done.wait (!%p399_p2), %s302_s27, 1024  }
  0xd8   : > { %552 = vsyncadd (!%p399_p2), %s302_s27, 4294966272  ;;  %s18_s14 = sadd.s32 1, %s575_s14   ;;  %s803_s9 = smov %s559_s10 }
  0xd9   : > { %p15_p5 = scmp.ge.s32.totalorder %s18_s14, 4   ;;  %s804_s10 = smov %s563_s11 }
  0xda   : > { %s805_s11 = smov %s655_s23  ;;  %s806_s12 = smov %s571_s13 }
  0xdb   : > { %s807_s13 = smov %s809_s17  ;;  %17 = sbr.rel (!%p15_p5) target bundleno = 6 (0x6), region = 73 }
  0xe2   :  { %307 = vsyncpa [#allocation3], 1 }
  0xe3   :  { %309 = vsyncpa [#allocation3 + $0x1], 1 }
  0xe4   :  { %310 = vsyncpa [#allocation4], 1 }
  0xe5   :  { %312 = vsyncpa [#allocation4 + $0x1], 1 }

</bundles_post_ra>
